<compile_context>
chip_gen: v5e
topology: v5e:2x2
jax: 0.10.0
libtpu: 0.0.40
codegen_flags: <defaults>
</compile_context>

<pallas_src>
import jax
import jax.numpy as jnp
from jax.experimental import pallas as pl
from jax.experimental.pallas import tpu as pltpu


def _make_head_kernel(S, tile_s, grid_s, inv_s, needs_mask, out_dtype):
    n_sub = max(1, tile_s // 128)  # 128-lane slabs per steady-state chunk

    def kernel(x_ref, w_ref, b_ref, o_ref, acc_ref):
        # x_ref:   (tile_n, C, tile_s)   streamed chunk of the flattened features
        # w_ref:   (C, K)                fc weight (transposed), f32
        # b_ref:   (1, K)                fc bias, f32
        # o_ref:   (tile_n, K)           logits for this N-tile
        # acc_ref: (tile_n, C, 128) f32  lane-partial running sums (resident over k)
        k = pl.program_id(1)
        last = grid_s - 1

        if grid_s > 1:
            @pl.when(k == 0)
            def _init():
                acc_ref[...] = jnp.zeros_like(acc_ref)

            @pl.when(k != last)
            def _steady():
                # Hot loop: pure vld + vadd (no XLU reduce, no mask).
                x = x_ref[...]
                part = acc_ref[...]
                for j in range(n_sub):
                    part = part + x[:, :, j * 128:(j + 1) * 128].astype(jnp.float32)
                acc_ref[...] = part

        @pl.when(k == last)
        def _finalize():
            x = x_ref[...]
            if needs_mask:
                # Ragged tail: zero the padded lanes (only in this branch).
                # k * tile_s fits int32 for any practical S.
                lane = k * tile_s + jax.lax.broadcasted_iota(
                    jnp.int32, (1, 1, tile_s), 2)
                x = jnp.where(lane < S, x, jnp.zeros_like(x))
            # Single cross-lane reduce per N-tile: tail chunk + lane partials.
            total = jnp.sum(x, axis=-1, dtype=jnp.float32)          # (tile_n, C)
            if grid_s > 1:
                total = total + jnp.sum(acc_ref[...], axis=-1)
            # Dropout(p=0.0, eval) -> identity.  mean @ W^T + b, with the 1/S
            # scale folded onto the small (tile_n, K) logits.
            logits = jnp.dot(total, w_ref[...],
                             preferred_element_type=jnp.float32)
            o_ref[...] = (logits * inv_s + b_ref[...]).astype(out_dtype)

    return kernel


def _tpu_vmem_bytes():
    try:
        info = pltpu.get_tpu_info()
        v = getattr(info, "vmem_capacity_bytes", None)
        if isinstance(v, int) and v > 0:
            return v
    except Exception:
        pass
    return 64 << 20  # conservative default (v7x per-TensorCore VMEM)


def _pick_tile_n(N, C, itemsize, block_budget):
    # Output block is (tile_n, K): tile_n must be a multiple of 8 or equal N.
    min_row = C * 128 * itemsize  # bytes per N-row of the minimum legal block
    cands = [c for c in (128, 64, 32, 16, 8) if N % c == 0]
    if not cands:
        return N
    # Prefer >= 2 N-tiles (keeps both v7x TensorCores busy) within the budget.
    for c in cands:
        if c * min_row <= block_budget and N // c >= 2:
            return c
    for c in cands:
        if c * min_row <= block_budget:
            return c
    return cands[-1]


def _pick_tile_s(S, row_bytes, block_budget, max_subchunks=64):
    if S * row_bytes <= block_budget:
        return S                                    # whole S in one chunk
    t = (block_budget // row_bytes) // 128 * 128
    return int(max(128, min(t, 128 * max_subchunks)))


def general_head_3d(x_ncdhw, fc_weight, fc_bias, *,
                    tile_n=None, tile_s=None, out_dtype=None):
    """Forward of GeneralHead3D.

    x_ncdhw: (N, C, T, H, W); fc_weight: (K, C); fc_bias: (K,). Returns (N, K).
    out_dtype defaults to x.dtype; pass jnp.float32 for strict fp32-fc parity
    with bf16 activations.
    """
    N, C, T, H, W = x_ncdhw.shape
    K = fc_weight.shape[0]
    S = T * H * W
    if out_dtype is None:
        out_dtype = x_ncdhw.dtype

    x_flat = x_ncdhw.reshape(N, C, S)                 # free reshape, no HBM transpose
    w_t = fc_weight.T.astype(jnp.float32)             # (C, K), tiny
    b2d = fc_bias.reshape(1, K).astype(jnp.float32)   # (1, K)

    itemsize = jnp.dtype(x_ncdhw.dtype).itemsize
    vmem_phys = _tpu_vmem_bytes()
    block_budget = max(2 << 20, vmem_phys // 8)       # ~8 MiB v7x / ~16 MiB v5e,v6e

    if tile_n is None:
        tile_n = _pick_tile_n(N, C, itemsize, block_budget)
    assert N % tile_n == 0 and (tile_n % 8 == 0 or tile_n == N)

    if tile_s is None:
        tile_s = _pick_tile_s(S, tile_n * C * itemsize, block_budget)
    grid_s = pl.cdiv(S, tile_s)
    assert tile_s == S or tile_s % 128 == 0
    needs_mask = (S % tile_s) != 0

    # Explicit scoped-VMEM budget: 2x double-buffered x block + lane-partial acc
    # + weights/bias/out + headroom, capped at ~3/4 of physical VMEM
    # (48 MiB on v7x, 96 MiB on v5e/v6e).
    needed = (2 * tile_n * C * tile_s * itemsize
              + tile_n * C * 128 * 4
              + 2 * (C * K + K) * 4
              + 2 * tile_n * K * 4
              + (4 << 20))
    vmem_limit = int(min(max(needed, 32 << 20), vmem_phys * 3 // 4))

    kernel = _make_head_kernel(S, tile_s, grid_s, 1.0 / S, needs_mask, out_dtype)

    return pl.pallas_call(
        kernel,
        out_shape=jax.ShapeDtypeStruct((N, K), out_dtype),
        grid=(N // tile_n, grid_s),
        in_specs=[
            pl.BlockSpec((tile_n, C, tile_s), lambda i, k: (i, 0, k)),
            pl.BlockSpec((C, K), lambda i, k: (0, 0)),
            pl.BlockSpec((1, K), lambda i, k: (0, 0)),
        ],
        out_specs=pl.BlockSpec((tile_n, K), lambda i, k: (i, 0)),
        scratch_shapes=[pltpu.VMEM((tile_n, C, 128), jnp.float32)],
        compiler_params=pltpu.CompilerParams(
            dimension_semantics=("parallel", "arbitrary"),
            vmem_limit_bytes=vmem_limit),
    )(x_flat, w_t, b2d)


if __name__ == "__main__":
    # Case 1: small shapes consistent with the module's forward
    # (feature_dims C = 32, num_classes = 16); single-chunk path, tile_n == N.
    N, C, T, H, W = 2, 32, 4, 8, 8
    num_classes = 16

    key = jax.random.PRNGKey(0)
    k_x, k_w = jax.random.split(key)
    x = jax.random.normal(k_x, (N, C, T, H, W), dtype=jnp.float32)

    # Deterministic parameter init matching GeneralHead3D.init_weights():
    #   fc.weight ~ Normal(0, 0.01), fc.bias = 0
    fc_weight = 0.01 * jax.random.normal(k_w, (num_classes, C), dtype=jnp.float32)
    fc_bias = jnp.zeros((num_classes,), dtype=jnp.float32)

    out = jax.block_until_ready(general_head_3d(x, fc_weight, fc_bias))
    ref = jnp.mean(x.reshape(N, C, -1), axis=-1) @ fc_weight.T + fc_bias
    assert out.shape == (N, num_classes)
    assert jnp.allclose(out, ref, atol=1e-5, rtol=1e-5)

    # Case 2: exercises the tiled parallel N axis, the multi-chunk steady-state
    # lane-partial accumulation (n_sub = 2), and the masked ragged tail.
    N2, C2, T2, H2, W2, K2 = 16, 64, 4, 9, 9, 24     # S = 324 -> chunks 256 + 68
    k_x2, k_w2, k_b2 = jax.random.split(jax.random.PRNGKey(1), 3)
    x2 = jax.random.normal(k_x2, (N2, C2, T2, H2, W2), dtype=jnp.float32)
    w2 = 0.01 * jax.random.normal(k_w2, (K2, C2), dtype=jnp.float32)
    b2 = jax.random.normal(k_b2, (K2,), dtype=jnp.float32)

    out2 = jax.block_until_ready(
        general_head_3d(x2, w2, b2, tile_n=8, tile_s=256))
    ref2 = jnp.mean(x2.reshape(N2, C2, -1), axis=-1) @ w2.T + b2
    assert out2.shape == (N2, K2)
    assert jnp.allclose(out2, ref2, atol=1e-4, rtol=1e-4)

    print("KERNEL_OK")
</pallas_src>

<mosaic_0001>
module attributes {stable_mosaic.version = 11 : i64} {
  func.func @kernel(%arg0: i32, %arg1: i32, %arg2: memref<2x32x256xf32, #tpu.memory_space<vmem>>, %arg3: memref<32x16xf32, #tpu.memory_space<vmem>>, %arg4: memref<1x16xf32, #tpu.memory_space<vmem>>, %arg5: memref<2x16xf32, #tpu.memory_space<vmem>>, %arg6: memref<2x32x128xf32, #tpu.memory_space<vmem>>) attributes {dimension_semantics = [#tpu.dimension_semantics<parallel>, #tpu.dimension_semantics<arbitrary>], iteration_bounds = array<i64: 1, 1>, scalar_prefetch = 0 : i64, scratch_operands = 1 : i64, tpu.core_type = #tpu.core_type<tc>, window_params = [{transform_indices = @transform_0, window_bounds = array<i64: 2, 32, 256>}, {pipeline_mode = #tpu.pipeline_mode<synchronous>, transform_indices = @transform_1, window_bounds = array<i64: 32, 16>}, {pipeline_mode = #tpu.pipeline_mode<synchronous>, transform_indices = @transform_2, window_bounds = array<i64: 1, 16>}, {transform_indices = @transform_3, window_bounds = array<i64: 2, 16>}]} {
    %c0_i32 = arith.constant 0 : i32
    %0 = arith.cmpi eq, %arg1, %c0_i32 : i32
    %1 = arith.extui %0 : i1 to i32
    %c0_i32_0 = arith.constant 0 : i32
    %2 = arith.cmpi ne, %1, %c0_i32_0 : i32
    scf.if %2 {
      %c0 = arith.constant 0 : index
      %c0_1 = arith.constant 0 : index
      %c0_2 = arith.constant 0 : index
      %3 = vector.load %arg2[%c0, %c0_1, %c0_2] : memref<2x32x256xf32, #tpu.memory_space<vmem>>, vector<2x32x256xf32>
      %cst = arith.constant dense<0.000000e+00> : vector<2x32xf32>
      %4 = vector.multi_reduction <add>, %3, %cst [2] : vector<2x32x256xf32> to vector<2x32xf32>
      %c0_3 = arith.constant 0 : index
      %c0_4 = arith.constant 0 : index
      %5 = vector.load %arg3[%c0_3, %c0_4] : memref<32x16xf32, #tpu.memory_space<vmem>>, vector<32x16xf32>
      %cst_5 = arith.constant dense<0.000000e+00> : vector<2x16xf32>
      %6 = tpu.matmul %4, %5, %cst_5 {dimension_numbers = #tpu.dot_dimension_numbers<[1], [0], [0], [1], [0, 0, 1, 1], [], []>} : vector<2x32xf32>, vector<32x16xf32>, vector<2x16xf32> -> vector<2x16xf32>
      %cst_6 = arith.constant 3.906250e-03 : f32
      %7 = vector.broadcast %cst_6 : f32 to vector<2x16xf32>
      %8 = arith.mulf %6, %7 : vector<2x16xf32>
      %c0_7 = arith.constant 0 : index
      %c0_8 = arith.constant 0 : index
      %9 = vector.load %arg4[%c0_7, %c0_8] : memref<1x16xf32, #tpu.memory_space<vmem>>, vector<1x16xf32>
      %10 = vector.broadcast %9 : vector<1x16xf32> to vector<2x16xf32>
      %11 = arith.addf %8, %10 : vector<2x16xf32>
      %c0_9 = arith.constant 0 : index
      %c0_10 = arith.constant 0 : index
      %12 = vector.load %arg5[%c0_9, %c0_10] : memref<2x16xf32, #tpu.memory_space<vmem>>, vector<2x16xf32>
      tpu.vector_store %arg5[%c0_9, %c0_10], %11 {strides = array<i32>} : memref<2x16xf32, #tpu.memory_space<vmem>>, vector<2x16xf32>,
    } else {
    }
    return
  }
  func.func @transform_0(%arg0: i32, %arg1: i32) -> (i32, i32, i32) {
    %c0_i32 = arith.constant 0 : i32
    %c0_i32_0 = arith.constant 0 : i32
    return %arg0, %c0_i32, %arg1 : i32, i32, i32
  }
  func.func @transform_1(%arg0: i32, %arg1: i32) -> (i32, i32) {
    %c0_i32 = arith.constant 0 : i32
    %c0_i32_0 = arith.constant 0 : i32
    %c0_i32_1 = arith.constant 0 : i32
    return %c0_i32, %c0_i32_0 : i32, i32
  }
  func.func @transform_2(%arg0: i32, %arg1: i32) -> (i32, i32) {
    %c0_i32 = arith.constant 0 : i32
    %c0_i32_0 = arith.constant 0 : i32
    %c0_i32_1 = arith.constant 0 : i32
    return %c0_i32, %c0_i32_0 : i32, i32
  }
  func.func @transform_3(%arg0: i32, %arg1: i32) -> (i32, i32) {
    %c0_i32 = arith.constant 0 : i32
    %c0_i32_0 = arith.constant 0 : i32
    return %arg0, %c0_i32 : i32, i32
  }
}

</mosaic_0001>

<bundles_post_ra>
// kernel: tpu_custom_call.1
= control target key start
LH: loop header
LB: loop body
LE: loop exit
PB: predicated region body
PF: predicated region fallthrough
CT: control target
= control target key end

     0   :  { %8 = vsyncpa [#allocation4], 0  ;;  %s262_s0 = inlined_call_operand.hbm [shape: f32[2,32,256], index: 0, kind: input, shape index: {}]   ;;  %s263_s1 = inlined_call_operand.vmem [shape: f32[32,16], index: 1, kind: input, shape index: {}]   ;;  %s264_s2 = inlined_call_operand.vmem [shape: f32[1,16], index: 2, kind: input, shape index: {}]   ;;  %s265_s3 = inlined_call_operand.hbm [shape: f32[2,16], index: 3, kind: output, shape index: {}]  }
   0x1   :  { %9 = vsyncpa [#allocation5], 0  ;;  %s14_s14 = sshll.u32 %s262_s0, 4  ;;  %s217_s15 = smov [#allocation3]   ;;  %s15_s14 = int_to_ptr.hbm [resolvable:$true] %s14_s14 }
   0x2   :  { %s16_s16 = sshll.u32 %s217_s15, 4  ;;  %s218_s17 = smov 256   ;;  %s17_s16 = int_to_ptr.vmem [resolvable:$true] %s16_s16 }
   0x3   :  { %s219_s18 = smov 16  }
   0x4   :  { %22 = dma.hbm_to_vmem [thread:$0]  %s15_s14, 2048, %s17_s16, [#allocation4], %s218_s17, %s218_s17, %s219_s18  }
   0x5   :  { %213 = dma.done.wait [#allocation4], 2048  }
   0x6   :  { %214 = vsyncadd [#allocation4], 4294965248  ;;  %v43_v0 = vld [vmem:[#allocation3 + $0x40] sm:$0xff]  ;;  %v44_v1 = vld [vmem:[#allocation3 + $0x48] sm:$0xff]  ;;  %v87_v29 = vlaneseq  ;;  %vm92_vm0 = vcmask 130112   ;;  %vm96_vm1 = vcmask 195712  }
   0x7   :  { %v35_v2 = vld [vmem:[#allocation3] sm:$0xff]  ;;  %v63_v3 = vadd.f32 %v44_v1, %v43_v0  ;;  %v36_v4 = vld [vmem:[#allocation3 + $0x8] sm:$0xff]  ;;  %v45_v9 = vld [vmem:[#allocation3 + $0x50] sm:$0xff]  ;;  %vm100_vm2 = vcmask 261312   ;;  %vm109_vm3 = vcmask 1041409   ;;  %vm111_vm4 = vcmask 261120  }
   0x8   :  { %v39_v5 = vld [vmem:[#allocation3 + $0x20] sm:$0xff]  ;;  %v40_v6 = vld [vmem:[#allocation3 + $0x28] sm:$0xff]  ;;  %v51_v7 = vadd.f32 %v36_v4, %v35_v2  ;;  %v46_v10 = vld [vmem:[#allocation3 + $0x58] sm:$0xff]  ;;  %v88_v32 = vand.u32 127, %v87_v29  ;;  %s220_s27 = smov [#allocation6]   ;;  %s149_s4 = sshll.u32 %s265_s3, 4  ;;  %s150_s4 = int_to_ptr.hbm [resolvable:$true] %s149_s4 }
   0x9   :  { %v57_v8 = vadd.f32 %v40_v6, %v39_v5  ;;  %64 = vadd.xlane.f32.xlu1 %v63_v3  ;;  %v37_v11 = vld [vmem:[#allocation3 + $0x10] sm:$0xff]  ;;  %v38_v12 = vld [vmem:[#allocation3 + $0x18] sm:$0xff]  ;;  %v47_v13 = vld [vmem:[#allocation3 + $0x60] sm:$0xff]  ;;  %v66_v15 = vadd.f32 %v46_v10, %v45_v9  ;;  %s147_s28 = sshll.u32 %s220_s27, 4  ;;  %vm140_vm5 = vcmask 123904   ;;  %s148_s28 = int_to_ptr.vmem [resolvable:$true] %s147_s28 }
   0xa   :  { %52 = vadd.xlane.f32.xlu0 %v51_v7  ;;  %v48_v14 = vld [vmem:[#allocation3 + $0x68] sm:$0xff]  ;;  %v54_v16 = vadd.f32 %v38_v12, %v37_v11  ;;  %v49_v18 = vld [vmem:[#allocation3 + $0x70] sm:$0xff]  ;;  %v50_v19 = vld [vmem:[#allocation3 + $0x78] sm:$0xff]  ;;  %v90_v33 = vadd.s32 4294967288, %v88_v32  ;;  %v94_v38 = vadd.s32 4294967280, %v88_v32  ;;  %v98_v41 = vadd.s32 4294967272, %v88_v32 }
   0xb   :  { %58 = vadd.xlane.f32.xlu2 %v57_v8  ;;  %v69_v17 = vadd.f32 %v48_v14, %v47_v13  ;;  %v41_v20 = vld [vmem:[#allocation3 + $0x30] sm:$0xff]  ;;  %v42_v21 = vld [vmem:[#allocation3 + $0x38] sm:$0xff]  ;;  %v72_v22 = vadd.f32 %v50_v19, %v49_v18  ;;  %v76_v26 = vld [vmem:[%s263_s1 + $0x8] sm:$0xff] }
   0xc   :  { %v60_v23 = vadd.f32 %v42_v21, %v41_v20  ;;  %v78_v24 = vld [vmem:[%s263_s1 + $0x18] sm:$0xff]  ;;  %v77_v25 = vld [vmem:[%s263_s1 + $0x10] sm:$0xff]  ;;  %v75_v27 = vld [vmem:[%s263_s1] sm:$0xff] }
   0xd   :  { %126 = vmatpush.msra.mxu0 %v78_v24  ;;  %v164_v56 = vld [vmem:[%s264_s2] ss:$0 sm:$0xff] }
   0xf   :  { %127 = vmatpush.msra.mxu0 %v77_v25 }
  0x11   :  { %67 = vadd.xlane.f32.xlu1 %v66_v15  ;;  %128 = vmatpush.msra.mxu0 %v76_v26 }
  0x12   :  { %55 = vadd.xlane.f32.xlu0 %v54_v16 }
  0x13   :  { %70 = vadd.xlane.f32.xlu2 %v69_v17  ;;  %129 = vmatpush.msra.mxu0 %v75_v27 }
  0x19   :  { %73 = vadd.xlane.f32.xlu1 %v72_v22 }
  0x1a   :  { %61 = vadd.xlane.f32.xlu0 %v60_v23 }
  0x7c   :  { %v65_v28 = vpop.xlane.xlu1 %64 }
  0x7d   :  { %v53_v30 = vpop.xlane.xlu0 %52  ;;  %v102_v40 = vperm.slane %v65_v28, %v88_v32 }
  0x7e   :  { %v59_v31 = vpop.xlane.xlu2 %58  ;;  %v89_v42 = vperm.slane %v53_v30, %v88_v32 }
  0x7f   :  { %v95_v47 = vperm.slane %v59_v31, %v94_v38 }
  0x84   :  { %v68_v34 = vpop.xlane.xlu1 %67 }
  0x85   :  { %v56_v35 = vpop.xlane.xlu0 %55  ;;  %v103_v36 = vperm.slane %v68_v34, %v90_v33 }
  0x86   :  { %v71_v37 = vpop.xlane.xlu2 %70  ;;  %v91_v39 = vperm.slane %v56_v35, %v90_v33 }
  0x87   :  { %v105_v43 = vperm.slane %v71_v37, %v94_v38  ;;  %v104_v44 = vsel %vm92_vm0, %v103_v36, %v102_v40 }
  0x88   :  { %v93_v45 = vsel %vm92_vm0, %v91_v39, %v89_v42 }
  0x89   :  { %v106_v50 = vsel %vm96_vm1, %v105_v43, %v104_v44  ;;  %v97_v52 = vsel %vm96_vm1, %v95_v47, %v93_v45 }
  0x8c   :  { %v74_v46 = vpop.xlane.xlu1 %73 }
  0x8d   :  { %v107_v48 = vperm.slane %v74_v46, %v98_v41  ;;  %v62_v49 = vpop.xlane.xlu0 %61 }
  0x8e   :  { %v99_v51 = vperm.slane %v62_v49, %v98_v41 }
  0x8f   :  { %v108_v53 = vsel %vm100_vm2, %v107_v48, %v106_v50 }
  0x90   :  { %v101_v54 = vsel %vm100_vm2, %v99_v51, %v97_v52 }
  0x91   :  { %v110_v55 = vsel %vm109_vm3, %v108_v53, %v101_v54 }
  0x92   :  { %159 = vmatmul.msk.f32.vlgmr.msra.gmra.mxu0 %vm111_vm4, %v110_v55 }
 0x10f   :  { %v131_v57 = vpop.f32.mrf.mxu0 }
 0x110   :  { %v134_v58 = vmul.f32 0.00390625, %v131_v57 }
 0x112   :  { %v139_v59 = vadd.f32 %v164_v56, %v134_v58 }
 0x114   :  { %141 = vst.msk [vmem:[#allocation6] sm:$0x3] %vm140_vm5, %v139_v59 }
 0x115   :  { %152 = dma.vmem_to_hbm [thread:$0]  %s148_s28, 32, %s150_s4, [#allocation5]  }
 0x116   :  { %215 = dma.done.wait [#allocation5], 32  }
 0x117   :  { %216 = vsyncadd [#allocation5], 4294967264 }
 0x118   :  { %157 = vsyncpa [#allocation4], 1 }
 0x119   :  { %158 = vsyncpa [#allocation5], 1 }

</bundles_post_ra>
